<compile_context>
chip_gen: v5e
topology: v5e:2x2
jax: 0.10.0
libtpu: 0.0.40
codegen_flags: <defaults>
</compile_context>

<pallas_src>
import functools

import jax
import jax.numpy as jnp
from jax.experimental import pallas as pl
from jax.experimental.pallas import tpu as pltpu

IN_DIM = 256
H1 = 128
H2 = 288
OUT_DIM = 288

# Lane-pad the 288-wide *intermediate* (layer-2 output / layer-3 input) to a
# multiple of 128 so both MXU feeds on that edge are unmasked and the padded
# lanes are guaranteed zeros.
H2_PAD = 384

TB_DEFAULT = 1024  # batch rows per grid step


def _round_up(x, m):
    return ((x + m - 1) // m) * m


def _choose_tile(B, tb):
    """Pick the batch tile: big to amortize step overhead, >=2 steps when possible."""
    if B <= 16:
        return _round_up(B, 8)
    # Aim for at least two grid steps (v7x megacore splits the grid), capped at tb.
    return max(8, min(tb, _round_up((B + 1) // 2, 8)))


def _query_mlp_kernel(q_ref, w1_ref, b1_ref, w2_ref, b2_ref, w3_ref, b3_ref, o_ref):
    # Layer 1: Linear(256 -> 128) + ReLU   (bf16 operands, f32 accumulation)
    x = q_ref[...].astype(jnp.bfloat16)
    h1 = jnp.dot(x, w1_ref[...], preferred_element_type=jnp.float32) + b1_ref[...]
    h1 = jnp.maximum(h1, 0.0).astype(jnp.bfloat16)
    # Layer 2: Linear(128 -> 288), output lane-padded to 384, + ReLU
    h2 = jnp.dot(h1, w2_ref[...], preferred_element_type=jnp.float32) + b2_ref[...]
    h2 = jnp.maximum(h2, 0.0).astype(jnp.bfloat16)
    # Layer 3: Linear(288 -> 288); w3 padded only on its input rows (384 x 288),
    # so the result is already 288-wide and is stored directly (lane-dense up to
    # the 288 = 2*128 + 32 tail).
    out = jnp.dot(h2, w3_ref[...], preferred_element_type=jnp.float32) + b3_ref[...]
    o_ref[...] = out


def prepare_params(params):
    """Pad the 288-wide intermediate dim to 384, cast weights to bf16 (biases f32).

    Input params use (in, out) layout, i.e. y = x @ W + b (transposed vs PyTorch).
    Padding uses explicit zeros, which is required for correctness (padded lanes
    must stay zero through bias + ReLU and the zero w3 rows).
    """
    w1, b1, w2, b2, w3, b3 = params
    w1p = w1.astype(jnp.bfloat16)
    b1p = b1.reshape(1, H1).astype(jnp.float32)
    w2p = jnp.zeros((H1, H2_PAD), jnp.bfloat16).at[:, :H2].set(w2.astype(jnp.bfloat16))
    b2p = jnp.zeros((1, H2_PAD), jnp.float32).at[:, :H2].set(b2.reshape(1, H2))
    w3p = jnp.zeros((H2_PAD, OUT_DIM), jnp.bfloat16).at[:H2, :].set(
        w3.astype(jnp.bfloat16))
    b3p = b3.reshape(1, OUT_DIM).astype(jnp.float32)
    return (w1p, b1p, w2p, b2p, w3p, b3p)


@functools.partial(jax.jit, static_argnames=("tb",))
def query_network_forward(query, prepped_params, tb=TB_DEFAULT):
    """query: [B, 256] float32 (or bfloat16). Returns [B, 4, 72] float32."""
    w1p, b1p, w2p, b2p, w3p, b3p = prepped_params
    B = query.shape[0]
    TB = _choose_tile(B, tb)

    const = lambda shape: pl.BlockSpec(shape, lambda i: (0, 0))  # VMEM-resident

    out = pl.pallas_call(
        _query_mlp_kernel,
        out_shape=jax.ShapeDtypeStruct((B, OUT_DIM), jnp.float32),
        grid=(pl.cdiv(B, TB),),          # partial last block handled by Pallas masking
        in_specs=[
            pl.BlockSpec((TB, IN_DIM), lambda i: (i, 0)),   # batch-tiled activations
            const((IN_DIM, H1)),
            const((1, H1)),
            const((H1, H2_PAD)),
            const((1, H2_PAD)),
            const((H2_PAD, OUT_DIM)),
            const((1, OUT_DIM)),
        ],
        out_specs=pl.BlockSpec((TB, OUT_DIM), lambda i: (i, 0)),
        compiler_params=pltpu.CompilerParams(
            dimension_semantics=("parallel",),   # megacore sharding on v7x
        ),
    )(query, w1p, b1p, w2p, b2p, w3p, b3p)

    # Pure metadata glue: PyTorch's `out.reshape(-1, 4, 72)`.
    return out.reshape(-1, 4, 72)


def init_params(key):
    """Deterministic init mirroring the PyTorch Linears (stored as (in, out))."""
    k1, k2, k3, k4, k5, k6 = jax.random.split(key, 6)

    def uinit(k, shape, fan_in):
        bound = 1.0 / jnp.sqrt(fan_in)
        return jax.random.uniform(k, shape, jnp.float32, -bound, bound)

    w1 = uinit(k1, (IN_DIM, H1), IN_DIM)
    b1 = uinit(k2, (1, H1), IN_DIM)
    w2 = uinit(k3, (H1, H2), H1)
    b2 = uinit(k4, (1, H2), H1)
    w3 = uinit(k5, (H2, OUT_DIM), H2)
    b3 = uinit(k6, (1, OUT_DIM), H2)
    return (w1, b1, w2, b2, w3, b3)


def _reference_bf16(query, prepped_params):
    """Plain-JAX reference with identical (bf16 operand / f32 accum) numerics."""
    w1p, b1p, w2p, b2p, w3p, b3p = prepped_params
    x = query.astype(jnp.bfloat16)
    h1 = jnp.maximum(jnp.dot(x, w1p, preferred_element_type=jnp.float32) + b1p, 0.0)
    h1 = h1.astype(jnp.bfloat16)
    h2 = jnp.maximum(jnp.dot(h1, w2p, preferred_element_type=jnp.float32) + b2p, 0.0)
    h2 = h2.astype(jnp.bfloat16)
    out = jnp.dot(h2, w3p, preferred_element_type=jnp.float32) + b3p
    return out.reshape(-1, 4, 72)


def _reference_f32(query, params):
    """Full-precision reference matching the original PyTorch module."""
    w1, b1, w2, b2, w3, b3 = params
    h = jnp.maximum(query @ w1 + b1, 0.0)
    h = jnp.maximum(h @ w2 + b2, 0.0)
    return (h @ w3 + b3).reshape(-1, 4, 72)


if __name__ == "__main__":
    key = jax.random.PRNGKey(0)
    kq, kq2, kp = jax.random.split(key, 3)

    params = init_params(kp)
    prepped = prepare_params(params)

    # Case 1: tiny batch (single tile).
    B1 = 8
    q1 = jax.random.normal(kq, (B1, IN_DIM), jnp.float32)
    out1 = jax.block_until_ready(query_network_forward(q1, prepped))
    assert out1.shape == (B1, 4, 72), out1.shape
    ref1 = _reference_bf16(q1, prepped)
    assert jnp.allclose(out1, ref1, atol=1e-3, rtol=1e-3)
    # Sanity vs. the f32 PyTorch-equivalent math (bf16 operands => looser tol).
    ref1_f32 = _reference_f32(q1, params)
    assert jnp.allclose(out1, ref1_f32, atol=1e-1, rtol=1e-1)

    # Case 2: batch not a multiple of the tile (exercises the no-pad cdiv grid
    # with a partial last block on both input and output).
    B2 = 300
    q2 = jax.random.normal(kq2, (B2, IN_DIM), jnp.float32)
    out2 = jax.block_until_ready(query_network_forward(q2, prepped))
    assert out2.shape == (B2, 4, 72), out2.shape
    ref2 = _reference_bf16(q2, prepped)
    assert jnp.allclose(out2, ref2, atol=1e-3, rtol=1e-3)

    print("KERNEL_OK")
</pallas_src>

<mosaic_0001>
module attributes {stable_mosaic.version = 11 : i64} {
  func.func @_query_mlp_kernel(%arg0: i32, %arg1: memref<8x256xf32, #tpu.memory_space<vmem>>, %arg2: memref<256x128xbf16, #tpu.memory_space<vmem>>, %arg3: memref<1x128xf32, #tpu.memory_space<vmem>>, %arg4: memref<128x384xbf16, #tpu.memory_space<vmem>>, %arg5: memref<1x384xf32, #tpu.memory_space<vmem>>, %arg6: memref<384x288xbf16, #tpu.memory_space<vmem>>, %arg7: memref<1x288xf32, #tpu.memory_space<vmem>>, %arg8: memref<8x288xf32, #tpu.memory_space<vmem>>) attributes {dimension_semantics = [#tpu.dimension_semantics<parallel>], iteration_bounds = array<i64: 1>, scalar_prefetch = 0 : i64, scratch_operands = 0 : i64, tpu.core_type = #tpu.core_type<tc>, window_params = [{transform_indices = @transform_0, window_bounds = array<i64: 8, 256>}, {pipeline_mode = #tpu.pipeline_mode<synchronous>, transform_indices = @transform_1, window_bounds = array<i64: 256, 128>}, {pipeline_mode = #tpu.pipeline_mode<synchronous>, transform_indices = @transform_2, window_bounds = array<i64: 1, 128>}, {pipeline_mode = #tpu.pipeline_mode<synchronous>, transform_indices = @transform_3, window_bounds = array<i64: 128, 384>}, {pipeline_mode = #tpu.pipeline_mode<synchronous>, transform_indices = @transform_4, window_bounds = array<i64: 1, 384>}, {pipeline_mode = #tpu.pipeline_mode<synchronous>, transform_indices = @transform_5, window_bounds = array<i64: 384, 288>}, {pipeline_mode = #tpu.pipeline_mode<synchronous>, transform_indices = @transform_6, window_bounds = array<i64: 1, 288>}, {transform_indices = @transform_7, window_bounds = array<i64: 8, 288>}]} {
    %c0 = arith.constant 0 : index
    %c0_0 = arith.constant 0 : index
    %0 = vector.load %arg1[%c0, %c0_0] : memref<8x256xf32, #tpu.memory_space<vmem>>, vector<8x256xf32>
    %1 = arith.truncf %0 : vector<8x256xf32> to vector<8x256xbf16>
    %c0_1 = arith.constant 0 : index
    %c0_2 = arith.constant 0 : index
    %2 = vector.load %arg2[%c0_1, %c0_2] : memref<256x128xbf16, #tpu.memory_space<vmem>>, vector<256x128xbf16>
    %cst = arith.constant dense<0.000000e+00> : vector<8x128xf32>
    %3 = tpu.matmul %1, %2, %cst {dimension_numbers = #tpu.dot_dimension_numbers<[1], [0], [0], [1], [0, 0, 1, 1], [], []>} : vector<8x256xbf16>, vector<256x128xbf16>, vector<8x128xf32> -> vector<8x128xf32>
    %c0_3 = arith.constant 0 : index
    %c0_4 = arith.constant 0 : index
    %4 = vector.load %arg3[%c0_3, %c0_4] : memref<1x128xf32, #tpu.memory_space<vmem>>, vector<1x128xf32>
    %5 = vector.broadcast %4 : vector<1x128xf32> to vector<8x128xf32>
    %6 = arith.addf %3, %5 : vector<8x128xf32>
    %cst_5 = arith.constant 0.000000e+00 : f32
    %7 = vector.broadcast %cst_5 : f32 to vector<8x128xf32>
    %8 = arith.maximumf %6, %7 : vector<8x128xf32>
    %9 = arith.truncf %8 : vector<8x128xf32> to vector<8x128xbf16>
    %c0_6 = arith.constant 0 : index
    %c0_7 = arith.constant 0 : index
    %10 = vector.load %arg4[%c0_6, %c0_7] : memref<128x384xbf16, #tpu.memory_space<vmem>>, vector<128x384xbf16>
    %cst_8 = arith.constant dense<0.000000e+00> : vector<8x384xf32>
    %11 = tpu.matmul %9, %10, %cst_8 {dimension_numbers = #tpu.dot_dimension_numbers<[1], [0], [0], [1], [0, 0, 1, 1], [], []>} : vector<8x128xbf16>, vector<128x384xbf16>, vector<8x384xf32> -> vector<8x384xf32>
    %c0_9 = arith.constant 0 : index
    %c0_10 = arith.constant 0 : index
    %12 = vector.load %arg5[%c0_9, %c0_10] : memref<1x384xf32, #tpu.memory_space<vmem>>, vector<1x384xf32>
    %13 = vector.broadcast %12 : vector<1x384xf32> to vector<8x384xf32>
    %14 = arith.addf %11, %13 : vector<8x384xf32>
    %cst_11 = arith.constant 0.000000e+00 : f32
    %15 = vector.broadcast %cst_11 : f32 to vector<8x384xf32>
    %16 = arith.maximumf %14, %15 : vector<8x384xf32>
    %17 = arith.truncf %16 : vector<8x384xf32> to vector<8x384xbf16>
    %c0_12 = arith.constant 0 : index
    %c0_13 = arith.constant 0 : index
    %18 = vector.load %arg6[%c0_12, %c0_13] : memref<384x288xbf16, #tpu.memory_space<vmem>>, vector<384x288xbf16>
    %cst_14 = arith.constant dense<0.000000e+00> : vector<8x288xf32>
    %19 = tpu.matmul %17, %18, %cst_14 {dimension_numbers = #tpu.dot_dimension_numbers<[1], [0], [0], [1], [0, 0, 1, 1], [], []>} : vector<8x384xbf16>, vector<384x288xbf16>, vector<8x288xf32> -> vector<8x288xf32>
    %c0_15 = arith.constant 0 : index
    %c0_16 = arith.constant 0 : index
    %20 = vector.load %arg7[%c0_15, %c0_16] : memref<1x288xf32, #tpu.memory_space<vmem>>, vector<1x288xf32>
    %21 = vector.broadcast %20 : vector<1x288xf32> to vector<8x288xf32>
    %22 = arith.addf %19, %21 : vector<8x288xf32>
    %c0_17 = arith.constant 0 : index
    %c0_18 = arith.constant 0 : index
    %23 = vector.load %arg8[%c0_17, %c0_18] : memref<8x288xf32, #tpu.memory_space<vmem>>, vector<8x288xf32>
    tpu.vector_store %arg8[%c0_17, %c0_18], %22 {strides = array<i32>} : memref<8x288xf32, #tpu.memory_space<vmem>>, vector<8x288xf32>,
    return
  }
  func.func @transform_0(%arg0: i32) -> (i32, i32) {
    %c0_i32 = arith.constant 0 : i32
    %c0_i32_0 = arith.constant 0 : i32
    return %arg0, %c0_i32 : i32, i32
  }
  func.func @transform_1(%arg0: i32) -> (i32, i32) {
    %c0_i32 = arith.constant 0 : i32
    %c0_i32_0 = arith.constant 0 : i32
    %c0_i32_1 = arith.constant 0 : i32
    return %c0_i32, %c0_i32_0 : i32, i32
  }
  func.func @transform_2(%arg0: i32) -> (i32, i32) {
    %c0_i32 = arith.constant 0 : i32
    %c0_i32_0 = arith.constant 0 : i32
    %c0_i32_1 = arith.constant 0 : i32
    return %c0_i32, %c0_i32_0 : i32, i32
  }
  func.func @transform_3(%arg0: i32) -> (i32, i32) {
    %c0_i32 = arith.constant 0 : i32
    %c0_i32_0 = arith.constant 0 : i32
    %c0_i32_1 = arith.constant 0 : i32
    return %c0_i32, %c0_i32_0 : i32, i32
  }
  func.func @transform_4(%arg0: i32) -> (i32, i32) {
    %c0_i32 = arith.constant 0 : i32
    %c0_i32_0 = arith.constant 0 : i32
    %c0_i32_1 = arith.constant 0 : i32
    return %c0_i32, %c0_i32_0 : i32, i32
  }
  func.func @transform_5(%arg0: i32) -> (i32, i32) {
    %c0_i32 = arith.constant 0 : i32
    %c0_i32_0 = arith.constant 0 : i32
    %c0_i32_1 = arith.constant 0 : i32
    return %c0_i32, %c0_i32_0 : i32, i32
  }
  func.func @transform_6(%arg0: i32) -> (i32, i32) {
    %c0_i32 = arith.constant 0 : i32
    %c0_i32_0 = arith.constant 0 : i32
    %c0_i32_1 = arith.constant 0 : i32
    return %c0_i32, %c0_i32_0 : i32, i32
  }
  func.func @transform_7(%arg0: i32) -> (i32, i32) {
    %c0_i32 = arith.constant 0 : i32
    %c0_i32_0 = arith.constant 0 : i32
    return %arg0, %c0_i32 : i32, i32
  }
}

</mosaic_0001>

<bundles_post_ra>
// kernel: query_network_forward.1
= control target key start
LH: loop header
LB: loop body
LE: loop exit
PB: predicated region body
PF: predicated region fallthrough
CT: control target
= control target key end

     0   :  { %vm1010_vm0 = vcmask 261120   ;;  %s2265_s1 = inlined_call_operand.vmem [shape: bf16[256,128], index: 1, kind: input, shape index: {}]   ;;  %s2266_s3 = inlined_call_operand.vmem [shape: bf16[128,384], index: 3, kind: input, shape index: {}]   ;;  %s2267_s2 = inlined_call_operand.vmem [shape: f32[1,128], index: 2, kind: input, shape index: {}]   ;;  %s2268_s0 = inlined_call_operand.vmem [shape: f32[8,256], index: 0, kind: input, shape index: {}]   ;;  %s2269_s5 = inlined_call_operand.vmem [shape: bf16[384,288], index: 5, kind: input, shape index: {}]   ;;  %s2270_s4 = inlined_call_operand.vmem [shape: f32[1,384], index: 4, kind: input, shape index: {}]   ;;  %s2271_s6 = inlined_call_operand.vmem [shape: f32[1,288], index: 6, kind: input, shape index: {}]   ;;  %s2272_s7 = inlined_call_operand.vmem [shape: f32[8,288], index: 7, kind: output, shape index: {}]  }
   0x1   :  { %v1471_v0 = vld [vmem:[%s2265_s1 + $0x38] sm:$0xff]  ;;  %v1470_v2 = vld [vmem:[%s2265_s1 + $0x30] sm:$0xff]  ;;  %v1469_v4 = vld [vmem:[%s2265_s1 + $0x28] sm:$0xff] }
   0x2   :  { %v1479_v1 = vld [vmem:[%s2265_s1 + $0x78] sm:$0xff]  ;;  %162 = vmatpush.bf16.msra.mxu0 %v1471_v0  ;;  %v1478_v3 = vld [vmem:[%s2265_s1 + $0x70] sm:$0xff]  ;;  %v1477_v5 = vld [vmem:[%s2265_s1 + $0x68] sm:$0xff] }
   0x3   :  { %175 = vmatpush.bf16.msra.mxu1 %v1479_v1  ;;  %v1166_v6 = vld [vmem:[%s2266_s3 + $0xa8] sm:$0xf]  ;;  %v1502_v7 = vld [vmem:[%s2266_s3 + $0xb0] sm:$0xf0]  ;;  %v1501_v8 = vld [vmem:[%s2266_s3 + $0xac] sm:$0xf] }
   0x4   :  { %v1167_v9 = vor.u32 %v1502_v7, %v1166_v6  ;;  %v1168_v10 = vld [vmem:[%s2266_s3 + $0xb4] sm:$0xf0]  ;;  %v1154_v12 = vld [vmem:[%s2266_s3 + $0x90] sm:$0xf]  ;;  %v1499_v13 = vld [vmem:[%s2266_s3 + $0x98] sm:$0xf0] }
   0x5   :  { %v1171_v11 = vor.u32 %v1501_v8, %v1168_v10  ;;  %v1498_v14 = vld [vmem:[%s2266_s3 + $0x94] sm:$0xf]  ;;  %v1468_v15 = vld [vmem:[%s2265_s1 + $0x20] sm:$0xff]  ;;  %v1155_v16 = vor.u32 %v1499_v13, %v1154_v12  ;;  %v1142_v19 = vld [vmem:[%s2266_s3 + $0x78] sm:$0xf] }
   0x6   :  { %163 = vmatpush.bf16.msra.mxu0 %v1470_v2  ;;  %358 = vmatpush.bf16.msra.mxu2 %v1167_v9  ;;  %v1156_v17 = vld [vmem:[%s2266_s3 + $0x9c] sm:$0xf0]  ;;  %v1496_v20 = vld [vmem:[%s2266_s3 + $0x80] sm:$0xf0]  ;;  %v1495_v22 = vld [vmem:[%s2266_s3 + $0x7c] sm:$0xf] }
   0x7   :  { %176 = vmatpush.bf16.msra.mxu1 %v1478_v3  ;;  %v1476_v18 = vld [vmem:[%s2265_s1 + $0x60] sm:$0xff]  ;;  %371 = vmatpush.bf16.msra.mxu3 %v1171_v11  ;;  %v1159_v21 = vor.u32 %v1498_v14, %v1156_v17  ;;  %v1144_v23 = vld [vmem:[%s2266_s3 + $0x84] sm:$0xf0]  ;;  %v1467_v24 = vld [vmem:[%s2265_s1 + $0x18] sm:$0xff]  ;;  %v1143_v25 = vor.u32 %v1496_v20, %v1142_v19 }
   0x8   :  { %v1475_v26 = vld [vmem:[%s2265_s1 + $0x58] sm:$0xff]  ;;  %v1130_v27 = vld [vmem:[%s2266_s3 + $0x60] sm:$0xf]  ;;  %v1493_v28 = vld [vmem:[%s2266_s3 + $0x68] sm:$0xf0]  ;;  %v1147_v29 = vor.u32 %v1495_v22, %v1144_v23 }
   0x9   :  { %v1492_v30 = vld [vmem:[%s2266_s3 + $0x64] sm:$0xf]  ;;  %v1132_v31 = vld [vmem:[%s2266_s3 + $0x6c] sm:$0xf0]  ;;  %v1131_v34 = vor.u32 %v1493_v28, %v1130_v27  ;;  %v1118_v35 = vld [vmem:[%s2266_s3 + $0x48] sm:$0xf] }
   0xa   :  { %164 = vmatpush.bf16.msra.mxu0 %v1469_v4  ;;  %359 = vmatpush.bf16.msra.mxu2 %v1155_v16  ;;  %v1466_v32 = vld [vmem:[%s2265_s1 + $0x10] sm:$0xff]  ;;  %v1135_v37 = vor.u32 %v1492_v30, %v1132_v31  ;;  %v1489_v38 = vld [vmem:[%s2266_s3 + $0x4c] sm:$0xf]  ;;  %v1120_v39 = vld [vmem:[%s2266_s3 + $0x54] sm:$0xf0] }
   0xb   :  { %177 = vmatpush.bf16.msra.mxu1 %v1477_v5  ;;  %372 = vmatpush.bf16.msra.mxu3 %v1159_v21  ;;  %v1474_v33 = vld [vmem:[%s2265_s1 + $0x50] sm:$0xff]  ;;  %v1465_v40 = vld [vmem:[%s2265_s1 + $0x8] sm:$0xff]  ;;  %v1487_v44 = vld [vmem:[%s2266_s3 + $0x38] sm:$0xf0]  ;;  %v1123_v46 = vor.u32 %v1489_v38, %v1120_v39 }
   0xc   :  { %v1490_v36 = vld [vmem:[%s2266_s3 + $0x50] sm:$0xf0]  ;;  %v1473_v42 = vld [vmem:[%s2265_s1 + $0x48] sm:$0xff]  ;;  %v1106_v43 = vld [vmem:[%s2266_s3 + $0x30] sm:$0xf] }
   0xd   :  { %v1119_v41 = vor.u32 %v1490_v36, %v1118_v35  ;;  %v1174_v45 = vld [vmem:[%s2266_s3 + $0xb0] sm:$0xf]  ;;  %v1503_v47 = vld [vmem:[%s2266_s3 + $0xb8] sm:$0xf0]  ;;  %v1486_v48 = vld [vmem:[%s2266_s3 + $0x34] sm:$0xf]  ;;  %v1107_v51 = vor.u32 %v1487_v44, %v1106_v43 }
   0xe   :  { %165 = vmatpush.bf16.msra.mxu0 %v1468_v15  ;;  %360 = vmatpush.bf16.msra.mxu2 %v1143_v25  ;;  %v1108_v49 = vld [vmem:[%s2266_s3 + $0x3c] sm:$0xf0]  ;;  %v27_v54 = vld [vmem:[%s2268_s0 + $0x8] sm:$0xff]  ;;  %v1175_v55 = vor.u32 %v1503_v47, %v1174_v45  ;;  %v1162_v57 = vld [vmem:[%s2266_s3 + $0x98] sm:$0xf] }
   0xf   :  { %178 = vmatpush.bf16.msra.mxu1 %v1476_v18  ;;  %373 = vmatpush.bf16.msra.mxu3 %v1147_v29  ;;  %v1464_v50 = vld [vmem:[%s2265_s1] sm:$0xff]  ;;  %v1111_v56 = vor.u32 %v1486_v48, %v1108_v49  ;;  %v29_v60 = vpack.c.bf16 %v27_v54, %v27_v54  ;;  %v1497_v63 = vld [vmem:[%s2266_s3 + $0x88] sm:$0xf0]  ;;  %v1138_v1 = vld [vmem:[%s2266_s3 + $0x68] sm:$0xf] }
  0x10   :  { %v1472_v52 = vld [vmem:[%s2265_s1 + $0x40] sm:$0xff]  ;;  %v1494_v2 = vld [vmem:[%s2266_s3 + $0x70] sm:$0xf0]  ;;  %v1126_v4 = vld [vmem:[%s2266_s3 + $0x50] sm:$0xf] }
  0x11   :  { %v26_v53 = vld [vmem:[%s2268_s0] sm:$0xff]  ;;  %v1139_v3 = vor.u32 %v1494_v2, %v1138_v1  ;;  %v1491_v5 = vld [vmem:[%s2266_s3 + $0x58] sm:$0xf0]  ;;  %v1114_v7 = vld [vmem:[%s2266_s3 + $0x38] sm:$0xf] }
  0x12   :  { %166 = vmatpush.bf16.msra.mxu0 %v1467_v24  ;;  %361 = vmatpush.bf16.msra.mxu2 %v1131_v34  ;;  %v1500_v58 = vld [vmem:[%s2266_s3 + $0xa0] sm:$0xf0]  ;;  %v28_v59 = vpack.c.bf16 %v26_v53, %v26_v53  ;;  %v1150_v62 = vld [vmem:[%s2266_s3 + $0x80] sm:$0xf]  ;;  %v1127_v6 = vor.u32 %v1491_v5, %v1126_v4  ;;  %v1094_v10 = vld [vmem:[%s2266_s3 + $0x18] sm:$0xf] }
  0x13   :  { %179 = vmatpush.bf16.msra.mxu1 %v1475_v26  ;;  %374 = vmatpush.bf16.msra.mxu3 %v1135_v37  ;;  %v1163_v61 = vor.u32 %v1500_v58, %v1162_v57  ;;  %v1151_v0 = vor.u32 %v1497_v63, %v1150_v62  ;;  %v1488_v8 = vld [vmem:[%s2266_s3 + $0x40] sm:$0xf0]  ;;  %v1483_v12 = vld [vmem:[%s2266_s3 + $0x1c] sm:$0xf]  ;;  %v1096_v14 = vld [vmem:[%s2266_s3 + $0x24] sm:$0xf0] }
  0x14   :  { %v1115_v9 = vor.u32 %v1488_v8, %v1114_v7  ;;  %v1484_v11 = vld [vmem:[%s2266_s3 + $0x20] sm:$0xf0]  ;;  %v1102_v15 = vld [vmem:[%s2266_s3 + $0x20] sm:$0xf]  ;;  %v1485_v16 = vld [vmem:[%s2266_s3 + $0x28] sm:$0xf0]  ;;  %v1099_v17 = vor.u32 %v1483_v12, %v1096_v14 }
  0x15   :  { %v1095_v13 = vor.u32 %v1484_v11, %v1094_v10  ;;  %v1103_v18 = vor.u32 %v1485_v16, %v1102_v15  ;;  %v1082_v19 = vld [vmem:[%s2266_s3] sm:$0xf]  ;;  %v1481_v20 = vld [vmem:[%s2266_s3 + $0x8] sm:$0xf0]  ;;  %v1480_v21 = vld [vmem:[%s2266_s3 + $0x4] sm:$0xf] }
  0x16   :  { %167 = vmatpush.bf16.msra.mxu0 %v1466_v32  ;;  %362 = vmatpush.bf16.msra.mxu2 %v1119_v41  ;;  %v1083_v22 = vor.u32 %v1481_v20, %v1082_v19  ;;  %v1084_v23 = vld [vmem:[%s2266_s3 + $0xc] sm:$0xf0]  ;;  %v1090_v24 = vld [vmem:[%s2266_s3 + $0x8] sm:$0xf]  ;;  %v1482_v25 = vld [vmem:[%s2266_s3 + $0x10] sm:$0xf0] }
  0x17   :  { %180 = vmatpush.bf16.msra.mxu1 %v1474_v33  ;;  %375 = vmatpush.bf16.msra.mxu3 %v1123_v46  ;;  %v1087_v26 = vor.u32 %v1480_v21, %v1084_v23  ;;  %v1091_v27 = vor.u32 %v1482_v25, %v1090_v24  ;;  %v1262_v28 = vld [vmem:[%s2269_s5 + $0xa8] sm:$0xf]  ;;  %v1526_v29 = vld [vmem:[%s2269_s5 + $0xb0] sm:$0xf0]  ;;  %v1250_v30 = vld [vmem:[%s2269_s5 + $0x90] sm:$0xf] }
  0x18   :  { %v1263_v31 = vor.u32 %v1526_v29, %v1262_v28  ;;  %v1523_v32 = vld [vmem:[%s2269_s5 + $0x98] sm:$0xf0]  ;;  %v1454_v33 = vld [vmem:[%s2269_s5 + $0x228] sm:$0xf]  ;;  %v1574_v34 = vld [vmem:[%s2269_s5 + $0x230] sm:$0xf0] }
  0x19   :  { %v1455_v35 = vor.u32 %v1574_v34, %v1454_v33  ;;  %v1442_v36 = vld [vmem:[%s2269_s5 + $0x210] sm:$0xf]  ;;  %v1251_v37 = vor.u32 %v1523_v32, %v1250_v30  ;;  %v1238_v38 = vld [vmem:[%s2269_s5 + $0x78] sm:$0xf]  ;;  %v1520_v39 = vld [vmem:[%s2269_s5 + $0x80] sm:$0xf0] }
  0x1a   :  { %168 = vmatpush.bf16.msra.mxu0 %v1465_v40  ;;  %363 = vmatpush.bf16.msra.mxu2 %v1107_v51  ;;  %v1571_v40 = vld [vmem:[%s2269_s5 + $0x218] sm:$0xf0]  ;;  %v1550_v43 = vld [vmem:[%s2269_s5 + $0x170] sm:$0xf0]  ;;  %v1525_v44 = vld [vmem:[%s2269_s5 + $0xac] sm:$0xf]  ;;  %v1239_v51 = vor.u32 %v1520_v39, %v1238_v38 }
  0x1b   :  { %181 = vmatpush.bf16.msra.mxu1 %v1473_v42  ;;  %376 = vmatpush.bf16.msra.mxu3 %v1111_v56  ;;  %v1443_v41 = vor.u32 %v1571_v40, %v1442_v36  ;;  %v1358_v42 = vld [vmem:[%s2269_s5 + $0x168] sm:$0xf]  ;;  %v1264_v46 = vld [vmem:[%s2269_s5 + $0xb4] sm:$0xf0]  ;;  %v1568_v48 = vld [vmem:[%s2269_s5 + $0x200] sm:$0xf0] }
  0x1c   :  { %v1359_v45 = vor.u32 %v1550_v43, %v1358_v42  ;;  %v1430_v47 = vld [vmem:[%s2269_s5 + $0x1f8] sm:$0xf]  ;;  %v1267_v49 = vor.u32 %v1525_v44, %v1264_v46  ;;  %v1522_v53 = vld [vmem:[%s2269_s5 + $0x94] sm:$0xf]  ;;  %v1252_v54 = vld [vmem:[%s2269_s5 + $0x9c] sm:$0xf0] }
  0x1d   :  { %v1517_v56 = vld [vmem:[%s2269_s5 + $0x68] sm:$0xf0]  ;;  %v1431_v57 = vor.u32 %v1568_v48, %v1430_v47  ;;  %v1334_v62 = vld [vmem:[%s2269_s5 + $0x138] sm:$0xf]  ;;  %v1544_v63 = vld [vmem:[%s2269_s5 + $0x140] sm:$0xf0] }
  0x1e   :  { %169 = vmatpush.bf16.msra.mxu0 %v1464_v50  ;;  %364 = vmatpush.bf16.msra.mxu2 %v1095_v13  ;;  %v1346_v50 = vld [vmem:[%s2269_s5 + $0x150] sm:$0xf]  ;;  %v1240_v1 = vld [vmem:[%s2269_s5 + $0x84] sm:$0xf0]  ;;  %v1514_v4 = vld [vmem:[%s2269_s5 + $0x50] sm:$0xf0]  ;;  %v1335_v5 = vor.u32 %v1544_v63, %v1334_v62 }
  0x1f   :  { %182 = vmatpush.bf16.msra.mxu1 %v1472_v52  ;;  %377 = vmatpush.bf16.msra.mxu3 %v1099_v17  ;;  %v1547_v52 = vld [vmem:[%s2269_s5 + $0x158] sm:$0xf0]  ;;  %v1406_v8 = vld [vmem:[%s2269_s5 + $0x1c8] sm:$0xf]  ;;  %v1541_v10 = vld [vmem:[%s2269_s5 + $0x128] sm:$0xf0] }
  0x20   :  { %v1347_v58 = vor.u32 %v1547_v52, %v1346_v50  ;;  %v1562_v11 = vld [vmem:[%s2269_s5 + $0x1d0] sm:$0xf0]  ;;  %v1516_v12 = vld [vmem:[%s2269_s5 + $0x64] sm:$0xf]  ;;  %v1228_v13 = vld [vmem:[%s2269_s5 + $0x6c] sm:$0xf0] }
  0x21   :  { %170 = vmatmul.bf16.vlgmr.msra.gmra.mxu0 %v28_v59  ;;  %v1255_v59 = vor.u32 %v1522_v53, %v1252_v54  ;;  %v1202_v15 = vld [vmem:[%s2269_s5 + $0x30] sm:$0xf]  ;;  %v1511_v16 = vld [vmem:[%s2269_s5 + $0x38] sm:$0xf0]  ;;  %v1231_v19 = vor.u32 %v1516_v12, %v1228_v13  ;;  %v1310_v21 = vld [vmem:[%s2269_s5 + $0x108] sm:$0xf] }
  0x22   :  { %384 = vmatpush.bf16.msrb.mxu0 %v1175_v55  ;;  %183 = vmatmul.bf16.vlgmr.msra.gmra.mxu1 %v29_v60  ;;  %v1226_v55 = vld [vmem:[%s2269_s5 + $0x60] sm:$0xf]  ;;  %v1394_v20 = vld [vmem:[%s2269_s5 + $0x1b0] sm:$0xf]  ;;  %v1559_v23 = vld [vmem:[%s2269_s5 + $0x1b8] sm:$0xf0] }
  0x23   :  { %365 = vmatpush.bf16.msra.mxu2 %v1083_v22  ;;  %378 = vmatpush.bf16.msra.mxu3 %v1087_v26  ;;  %v1418_v60 = vld [vmem:[%s2269_s5 + $0x1e0] sm:$0xf]  ;;  %v1227_v2 = vor.u32 %v1517_v56, %v1226_v55  ;;  %v1538_v22 = vld [vmem:[%s2269_s5 + $0x110] sm:$0xf0]  ;;  %v1513_v24 = vld [vmem:[%s2269_s5 + $0x4c] sm:$0xf] }
  0x24   :  { %891 = vmatpush.bf16.msrb.mxu1 %v1263_v31  ;;  %v1216_v25 = vld [vmem:[%s2269_s5 + $0x54] sm:$0xf0]  ;;  %v1576_v26 = vld [vmem:[%s2267_s2] ss:$0 sm:$0xff]  ;;  %v1508_v29 = vld [vmem:[%s2269_s5 + $0x20] sm:$0xf0]  ;;  %v1311_v30 = vor.u32 %v1538_v22, %v1310_v21  ;;  %v1395_v31 = vor.u32 %v1559_v23, %v1394_v20 }
  0x25   :  { %v1190_v28 = vld [vmem:[%s2269_s5 + $0x18] sm:$0xf]  ;;  %v1219_v32 = vor.u32 %v1513_v24, %v1216_v25  ;;  %v1298_v34 = vld [vmem:[%s2269_s5 + $0xf0] sm:$0xf]  ;;  %v1556_v36 = vld [vmem:[%s2269_s5 + $0x1a0] sm:$0xf0] }
  0x26   :  { %385 = vmatpush.bf16.msrb.mxu0 %v1163_v61  ;;  %v1565_v61 = vld [vmem:[%s2269_s5 + $0x1e8] sm:$0xf0]  ;;  %v1382_v33 = vld [vmem:[%s2269_s5 + $0x198] sm:$0xf]  ;;  %v1204_v38 = vld [vmem:[%s2269_s5 + $0x3c] sm:$0xf0]  ;;  %v1191_v42 = vor.u32 %v1508_v29, %v1190_v28 }
  0x27   :  { %917 = vmatpush.bf16.msrb.mxu3 %v1455_v35  ;;  %904 = vmatpush.bf16.msrb.mxu2 %v1359_v45  ;;  %v1535_v35 = vld [vmem:[%s2269_s5 + $0xf8] sm:$0xf0]  ;;  %v1178_v44 = vld [vmem:[%s2269_s5] sm:$0xf]  ;;  %v1505_v45 = vld [vmem:[%s2269_s5 + $0x8] sm:$0xf0]  ;;  %v1383_v46 = vor.u32 %v1556_v36, %v1382_v33 }
  0x28   :  { %892 = vmatpush.bf16.msrb.mxu1 %v1251_v37  ;;  %v1510_v37 = vld [vmem:[%s2269_s5 + $0x34] sm:$0xf]  ;;  %v1299_v43 = vor.u32 %v1535_v35, %v1298_v34  ;;  %v1360_v50 = vld [vmem:[%s2269_s5 + $0x174] sm:$0xf0]  ;;  %v1553_v52 = vld [vmem:[%s2269_s5 + $0x188] sm:$0xf0] }
  0x29   :  { %v1207_v47 = vor.u32 %v1510_v37, %v1204_v38  ;;  %v1270_v53 = vld [vmem:[%s2269_s5 + $0xb0] sm:$0xf]  ;;  %v1527_v54 = vld [vmem:[%s2269_s5 + $0xb8] sm:$0xf0]  ;;  %v1286_v56 = vld [vmem:[%s2269_s5 + $0xd8] sm:$0xf] }
  0x2a   :  { %386 = vmatpush.bf16.msrb.mxu0 %v1151_v0  ;;  %v1519_v0 = vld [vmem:[%s2269_s5 + $0x7c] sm:$0xf]  ;;  %v1546_v63 = vld [vmem:[%s2269_s5 + $0x154] sm:$0xf]  ;;  %v1180_v12 = vld [vmem:[%s2269_s5 + $0xc] sm:$0xf0] }
  0x2b   :  { %918 = vmatpush.bf16.msrb.mxu3 %v1443_v41  ;;  %905 = vmatpush.bf16.msrb.mxu2 %v1347_v58  ;;  %v1243_v7 = vor.u32 %v1519_v0, %v1240_v1  ;;  %v1179_v58 = vor.u32 %v1505_v45, %v1178_v44  ;;  %v1573_v13 = vld [vmem:[%s2269_s5 + $0x22c] sm:$0xf]  ;;  %v1246_v29 = vld [vmem:[%s2269_s5 + $0x80] sm:$0xf]  ;;  %v1312_v33 = vld [vmem:[%s2269_s5 + $0x114] sm:$0xf0] }
  0x2c   :  { %893 = vmatpush.bf16.msrb.mxu1 %v1239_v51  ;;  %v1370_v51 = vld [vmem:[%s2269_s5 + $0x180] sm:$0xf]  ;;  %v1570_v35 = vld [vmem:[%s2269_s5 + $0x214] sm:$0xf]  ;;  %v1354_v37 = vld [vmem:[%s2269_s5 + $0x158] sm:$0xf] }
  0x2d   :  { %v1371_v0 = vor.u32 %v1553_v52, %v1370_v51  ;;  %v1444_v36 = vld [vmem:[%s2269_s5 + $0x21c] sm:$0xf0]  ;;  %v1534_v44 = vld [vmem:[%s2269_s5 + $0xf4] sm:$0xf]  ;;  %v1545_v51 = vld [vmem:[%s2269_s5 + $0x148] sm:$0xf0] }
  0x2e   :  { %387 = vmatpush.bf16.msrb.mxu0 %v1139_v3  ;;  %v1214_v3 = vld [vmem:[%s2269_s5 + $0x48] sm:$0xf]  ;;  %v1447_v38 = vor.u32 %v1570_v35, %v1444_v36  ;;  %v1300_v45 = vld [vmem:[%s2269_s5 + $0xfc] sm:$0xf0]  ;;  %v1530_v35 = vld [vmem:[%s2269_s5 + $0xd0] sm:$0xf0] }
  0x2f   :  { %919 = vmatpush.bf16.msrb.mxu3 %v1431_v57  ;;  %v1215_v14 = vor.u32 %v1514_v4, %v1214_v3  ;;  %906 = vmatpush.bf16.msrb.mxu2 %v1335_v5  ;;  %v1532_v57 = vld [vmem:[%s2269_s5 + $0xe0] sm:$0xf0]  ;;  %v1348_v3 = vld [vmem:[%s2269_s5 + $0x15c] sm:$0xf0]  ;;  %v1271_v4 = vor.u32 %v1527_v54, %v1270_v53  ;;  %v1222_v53 = vld [vmem:[%s2269_s5 + $0x50] sm:$0xf] }
  0x30   :  { %894 = vmatpush.bf16.msrb.mxu1 %v1227_v2  ;;  %v1287_v5 = vor.u32 %v1532_v57, %v1286_v56  ;;  %v1515_v54 = vld [vmem:[%s2269_s5 + $0x58] sm:$0xf0]  ;;  %v1288_v57 = vld [vmem:[%s2269_s5 + $0xe4] sm:$0xf0] }
  0x31   :  { %v1531_v56 = vld [vmem:[%s2269_s5 + $0xdc] sm:$0xf] }
  0x32   :  { %388 = vmatpush.bf16.msrb.mxu0 %v1127_v6  ;;  %v1419_v6 = vor.u32 %v1565_v61, %v1418_v60  ;;  %v1192_v60 = vld [vmem:[%s2269_s5 + $0x24] sm:$0xf0] }
  0x34   :  { %920 = vmatpush.bf16.msrb.mxu3 %v1419_v6  ;;  %895 = vmatpush.bf16.msrb.mxu1 %v1215_v14  ;;  %v1258_v6 = vld [vmem:[%s2269_s5 + $0x98] sm:$0xf] }
  0x35   :  { %v1456_v14 = vld [vmem:[%s2269_s5 + $0x234] sm:$0xf0] }
  0x36   :  { %389 = vmatpush.bf16.msrb.mxu0 %v1115_v9  ;;  %v1322_v9 = vld [vmem:[%s2269_s5 + $0x120] sm:$0xf]  ;;  %v1459_v23 = vor.u32 %v1573_v13, %v1456_v14  ;;  %v1509_v14 = vld [vmem:[%s2269_s5 + $0x28] sm:$0xf0] }
  0x37   :  { %v1323_v17 = vor.u32 %v1541_v10, %v1322_v9  ;;  %v1274_v9 = vld [vmem:[%s2269_s5 + $0xc0] sm:$0xf]  ;;  %v1529_v10 = vld [vmem:[%s2269_s5 + $0xc8] sm:$0xf0] }
  0x38   :  { %v1275_v21 = vor.u32 %v1529_v10, %v1274_v9  ;;  %v1318_v9 = vld [vmem:[%s2269_s5 + $0x110] sm:$0xf]  ;;  %v1198_v13 = vld [vmem:[%s2269_s5 + $0x20] sm:$0xf] }
  0x39   :  { %907 = vmatpush.bf16.msrb.mxu2 %v1323_v17  ;;  %v1551_v17 = vld [vmem:[%s2269_s5 + $0x178] sm:$0xf0] }
  0x3a   :  { %390 = vmatpush.bf16.msrb.mxu0 %v1103_v18  ;;  %v1407_v18 = vor.u32 %v1562_v11, %v1406_v8  ;;  %v1504_v11 = vld [vmem:[%s2269_s5 + $0x4] sm:$0xf] }
  0x3b   :  { %v1183_v22 = vor.u32 %v1504_v11, %v1180_v12  ;;  %v1539_v11 = vld [vmem:[%s2269_s5 + $0x118] sm:$0xf0] }
  0x3c   :  { %921 = vmatpush.bf16.msrb.mxu3 %v1407_v18  ;;  %v1543_v18 = vld [vmem:[%s2269_s5 + $0x13c] sm:$0xf]  ;;  %v1319_v12 = vor.u32 %v1539_v11, %v1318_v9  ;;  %v1557_v11 = vld [vmem:[%s2269_s5 + $0x1a8] sm:$0xf0] }
  0x3d   :  { %908 = vmatpush.bf16.msrb.mxu2 %v1311_v30  ;;  %v1521_v30 = vld [vmem:[%s2269_s5 + $0x88] sm:$0xf0] }
  0x3e   :  { %391 = vmatpush.bf16.msrb.mxu0 %v1091_v27  ;;  %v1203_v27 = vor.u32 %v1511_v16, %v1202_v15  ;;  %v1351_v15 = vor.u32 %v1546_v63, %v1348_v3  ;;  %v1366_v16 = vld [vmem:[%s2269_s5 + $0x170] sm:$0xf]  ;;  %v1542_v63 = vld [vmem:[%s2269_s5 + $0x130] sm:$0xf0] }
  0x3f   :  { %v1367_v24 = vor.u32 %v1551_v17, %v1366_v16  ;;  %v1199_v16 = vor.u32 %v1509_v14, %v1198_v13  ;;  %v1396_v17 = vld [vmem:[%s2269_s5 + $0x1bc] sm:$0xf0]  ;;  %v1378_v13 = vld [vmem:[%s2269_s5 + $0x188] sm:$0xf]  ;;  %v1554_v14 = vld [vmem:[%s2269_s5 + $0x190] sm:$0xf0] }
  0x40   :  { %896 = vmatpush.bf16.msrb.mxu1 %v1203_v27  ;;  %922 = vmatpush.bf16.msrb.mxu3 %v1395_v31  ;;  %v1324_v27 = vld [vmem:[%s2269_s5 + $0x12c] sm:$0xf0]  ;;  %v1247_v31 = vor.u32 %v1521_v30, %v1246_v29 }
  0x41   :  { %909 = vmatpush.bf16.msrb.mxu2 %v1299_v43 }
  0x42   :  { %930 = vmatpush.bf16.msra.mxu0 %v1267_v49  ;;  %v1549_v49 = vld [vmem:[%s2269_s5 + $0x16c] sm:$0xf] }
  0x43   :  { %v1363_v62 = vor.u32 %v1549_v49, %v1360_v50  ;;  %v1342_v49 = vld [vmem:[%s2269_s5 + $0x140] sm:$0xf] }
  0x44   :  { %897 = vmatpush.bf16.msrb.mxu1 %v1191_v42  ;;  %923 = vmatpush.bf16.msrb.mxu3 %v1383_v46  ;;  %v1518_v42 = vld [vmem:[%s2269_s5 + $0x70] sm:$0xf0]  ;;  %v1303_v46 = vor.u32 %v1534_v44, %v1300_v45  ;;  %v1343_v52 = vor.u32 %v1545_v51, %v1342_v49  ;;  %v1462_v49 = vld [vmem:[%s2269_s5 + $0x230] sm:$0xf] }
  0x45   :  { %910 = vmatpush.bf16.msrb.mxu2 %v1287_v5  ;;  %v1276_v5 = vld [vmem:[%s2269_s5 + $0xcc] sm:$0xf0] }
  0x46   :  { %931 = vmatpush.bf16.msra.mxu0 %v1255_v59  ;;  %v1507_v59 = vld [vmem:[%s2269_s5 + $0x1c] sm:$0xf] }
  0x47   :  { %v1195_v8 = vor.u32 %v1507_v59, %v1192_v60  ;;  %v1564_v59 = vld [vmem:[%s2269_s5 + $0x1e4] sm:$0xf]  ;;  %v1420_v60 = vld [vmem:[%s2269_s5 + $0x1ec] sm:$0xf0] }
  0x48   :  { %898 = vmatpush.bf16.msrb.mxu1 %v1179_v58  ;;  %924 = vmatpush.bf16.msrb.mxu3 %v1371_v0  ;;  %v1291_v58 = vor.u32 %v1531_v56, %v1288_v57  ;;  %v1450_v57 = vld [vmem:[%s2269_s5 + $0x218] sm:$0xf] }
  0x49   :  { %911 = vmatpush.bf16.msrb.mxu2 %v1275_v21 }
  0x4a   :  { %932 = vmatpush.bf16.msra.mxu0 %v1243_v7  ;;  %v1524_v7 = vld [vmem:[%s2269_s5 + $0xa0] sm:$0xf0] }
  0x4b   :  { %v1259_v20 = vor.u32 %v1524_v7, %v1258_v6  ;;  %v1561_v7 = vld [vmem:[%s2269_s5 + $0x1cc] sm:$0xf] }
  0x4c   :  { %943 = vmatpush.bf16.msra.mxu1 %v1363_v62  ;;  %v1423_v62 = vor.u32 %v1564_v59, %v1420_v60 }
  0x4e   :  { %933 = vmatpush.bf16.msra.mxu0 %v1231_v19  ;;  %v1336_v19 = vld [vmem:[%s2269_s5 + $0x144] sm:$0xf0] }
  0x4f   :  { %v1339_v25 = vor.u32 %v1543_v18, %v1336_v19  ;;  %v1306_v18 = vld [vmem:[%s2269_s5 + $0xf8] sm:$0xf]  ;;  %v1536_v19 = vld [vmem:[%s2269_s5 + $0x100] sm:$0xf0] }
  0x50   :  { %944 = vmatpush.bf16.msra.mxu1 %v1351_v15  ;;  %v1558_v15 = vld [vmem:[%s2269_s5 + $0x1b4] sm:$0xf]  ;;  %v1307_v21 = vor.u32 %v1536_v19, %v1306_v18 }
  0x52   :  { %934 = vmatpush.bf16.msra.mxu0 %v1219_v32  ;;  %v1537_v32 = vld [vmem:[%s2269_s5 + $0x10c] sm:$0xf] }
  0x53   :  { %v1315_v34 = vor.u32 %v1537_v32, %v1312_v33  ;;  %v1372_v32 = vld [vmem:[%s2269_s5 + $0x18c] sm:$0xf0]  ;;  %v1282_v33 = vld [vmem:[%s2269_s5 + $0xc8] sm:$0xf] }
  0x54   :  { %945 = vmatpush.bf16.msra.mxu1 %v1339_v25  ;;  %v1283_v36 = vor.u32 %v1530_v35, %v1282_v33 }
  0x56   :  { %935 = vmatpush.bf16.msra.mxu0 %v1207_v47  ;;  %v1567_v47 = vld [vmem:[%s2269_s5 + $0x1fc] sm:$0xf] }
  0x5a   :  { %936 = vmatpush.bf16.msra.mxu0 %v1195_v8  ;;  %v1408_v8 = vld [vmem:[%s2269_s5 + $0x1d4] sm:$0xf0] }
  0x5b   :  { %v1411_v10 = vor.u32 %v1561_v7, %v1408_v8  ;;  %v1402_v7 = vld [vmem:[%s2269_s5 + $0x1b8] sm:$0xf]  ;;  %v1560_v8 = vld [vmem:[%s2269_s5 + $0x1c0] sm:$0xf0] }
  0x5c   :  { %v1403_v9 = vor.u32 %v1560_v8, %v1402_v7 }
  0x5e   :  { %937 = vmatpush.bf16.msra.mxu0 %v1183_v22  ;;  %v1186_v22 = vld [vmem:[%s2269_s5 + $0x8] sm:$0xf] }
  0x9e   :  { %v171_v39 = vpop.f32.mrf.mxu0 }
  0x9f   :  { %v184_v40 = vpop.f32.mrf.mxu1  ;;  %v172_v41 = vadd.f32 %v1576_v26, %v171_v39  ;;  %v1540_v26 = vld [vmem:[%s2269_s5 + $0x124] sm:$0xf] }
  0xa0   :  { %v1327_v28 = vor.u32 %v1540_v26, %v1324_v27  ;;  %v1548_v39 = vld [vmem:[%s2269_s5 + $0x160] sm:$0xf0]  ;;  %v1384_v26 = vld [vmem:[%s2269_s5 + $0x1a4] sm:$0xf0]  ;;  %v1294_v27 = vld [vmem:[%s2269_s5 + $0xe0] sm:$0xf] }
  0xa1   :  { %v185_v48 = vadd.f32 %v184_v40, %v172_v41  ;;  %v1355_v40 = vor.u32 %v1548_v39, %v1354_v37  ;;  %v1234_v41 = vld [vmem:[%s2269_s5 + $0x68] sm:$0xf]  ;;  %v222_v37 = vld [vmem:[%s2270_s4] sm:$0x7] }
  0xa2   :  { %946 = vmatpush.bf16.msra.mxu1 %v1327_v28  ;;  %v1235_v43 = vor.u32 %v1518_v42, %v1234_v41  ;;  %v1533_v28 = vld [vmem:[%s2269_s5 + $0xe8] sm:$0xf0]  ;;  %v224_v41 = vperm.slane %v222_v37, 0  ;;  %v225_v42 = vperm.slane %v222_v37, 1 }
  0xa3   :  { %v188_v55 = vmax.f32 %v185_v48, 0.0  ;;  %v1432_v48 = vld [vmem:[%s2269_s5 + $0x204] sm:$0xf0]  ;;  %v1295_v30 = vor.u32 %v1533_v28, %v1294_v27 }
  0xa4   :  { %v1435_v50 = vor.u32 %v1567_v47, %v1432_v48 }
  0xa5   :  { %v189_v61 = vpack.c.bf16 %v188_v55, %v188_v55  ;;  %v1223_v55 = vor.u32 %v1515_v54, %v1222_v53 }
  0xa6   :  { %v173_v1 = vpop.f32.mrf.mxu0  ;;  %947 = vmatpush.bf16.msra.mxu1 %v1315_v34 }
  0xa7   :  { %v186_v2 = vpop.f32.mrf.mxu1  ;;  %366 = vmatmul.bf16.vlgmr.msra.gmra.mxu2 %v189_v61  ;;  %379 = vmatmul.bf16.vlgmr.msra.gmra.mxu3 %v189_v61  ;;  %v1210_v1 = vld [vmem:[%s2269_s5 + $0x38] sm:$0xf] }
  0xa8   :  { %392 = vmatmul.bf16.vlgmr.msrb.gmra.mxu0 %v189_v61  ;;  %969 = vmatpush.bf16.msra.mxu3 %v1271_v4  ;;  %v1330_v61 = vld [vmem:[%s2269_s5 + $0x128] sm:$0xf]  ;;  %v1512_v2 = vld [vmem:[%s2269_s5 + $0x40] sm:$0xf0] }
  0xa9   :  { %956 = vmatpush.bf16.msra.mxu2 %v1459_v23  ;;  %982 = vmatpush.bf16.msrb.mxu0 %v1367_v24  ;;  %v1331_v0 = vor.u32 %v1542_v63, %v1330_v61  ;;  %v1211_v3 = vor.u32 %v1512_v2, %v1210_v1  ;;  %v1528_v4 = vld [vmem:[%s2269_s5 + $0xc4] sm:$0xf]  ;;  %v1506_v23 = vld [vmem:[%s2269_s5 + $0x10] sm:$0xf0]  ;;  %v1555_v24 = vld [vmem:[%s2269_s5 + $0x19c] sm:$0xf] }
  0xaa   :  { %948 = vmatpush.bf16.msra.mxu1 %v1303_v46  ;;  %v1279_v6 = vor.u32 %v1528_v4, %v1276_v5  ;;  %v1187_v25 = vor.u32 %v1506_v23, %v1186_v22  ;;  %v1387_v29 = vor.u32 %v1555_v24, %v1384_v26  ;;  %v1569_v63 = vld [vmem:[%s2269_s5 + $0x208] sm:$0xf0]  ;;  %v1426_v1 = vld [vmem:[%s2269_s5 + $0x1e8] sm:$0xf]  ;;  %v1566_v2 = vld [vmem:[%s2269_s5 + $0x1f0] sm:$0xf0] }
  0xab   :  { %v1414_v4 = vld [vmem:[%s2269_s5 + $0x1d0] sm:$0xf]  ;;  %v1563_v5 = vld [vmem:[%s2269_s5 + $0x1d8] sm:$0xf0] }
  0xac   :  { %970 = vmatpush.bf16.msra.mxu3 %v1259_v20  ;;  %v1399_v20 = vor.u32 %v1558_v15, %v1396_v17  ;;  %v1379_v15 = vor.u32 %v1554_v14, %v1378_v13 }
  0xad   :  { %957 = vmatpush.bf16.msra.mxu2 %v1447_v38  ;;  %983 = vmatpush.bf16.msrb.mxu0 %v1355_v40  ;;  %v226_v38 = vperm.slane %v222_v37, 2 }
  0xae   :  { %949 = vmatpush.bf16.msra.mxu1 %v1291_v58  ;;  %v1572_v58 = vld [vmem:[%s2269_s5 + $0x220] sm:$0xf0] }
  0xaf   :  { %v1451_v61 = vor.u32 %v1572_v58, %v1450_v57 }
  0xb0   :  { %971 = vmatpush.bf16.msra.mxu3 %v1247_v31  ;;  %v1552_v31 = vld [vmem:[%s2269_s5 + $0x184] sm:$0xf] }
  0xb1   :  { %958 = vmatpush.bf16.msra.mxu2 %v1435_v50  ;;  %984 = vmatpush.bf16.msrb.mxu0 %v1343_v52  ;;  %v1375_v34 = vor.u32 %v1552_v31, %v1372_v32  ;;  %v1575_v50 = vld [vmem:[%s2269_s5 + $0x238] sm:$0xf0] }
  0xb2   :  { %950 = vmatpush.bf16.msra.mxu1 %v1279_v6  ;;  %v1463_v54 = vor.u32 %v1575_v50, %v1462_v49  ;;  %v1415_v6 = vor.u32 %v1563_v5, %v1414_v4 }
  0xb4   :  { %972 = vmatpush.bf16.msra.mxu3 %v1235_v43 }
  0xb5   :  { %959 = vmatpush.bf16.msra.mxu2 %v1423_v62  ;;  %985 = vmatpush.bf16.msrb.mxu0 %v1331_v0  ;;  %v1438_v62 = vld [vmem:[%s2269_s5 + $0x200] sm:$0xf] }
  0xb6   :  { %v1439_v0 = vor.u32 %v1569_v63, %v1438_v62 }
  0xb8   :  { %973 = vmatpush.bf16.msra.mxu3 %v1223_v55 }
  0xb9   :  { %960 = vmatpush.bf16.msra.mxu2 %v1411_v10  ;;  %986 = vmatpush.bf16.msrb.mxu0 %v1319_v12  ;;  %v1390_v10 = vld [vmem:[%s2269_s5 + $0x1a0] sm:$0xf] }
  0xba   :  { %v1391_v12 = vor.u32 %v1557_v11, %v1390_v10 }
  0xbc   :  { %974 = vmatpush.bf16.msra.mxu3 %v1211_v3  ;;  %v1427_v3 = vor.u32 %v1566_v2, %v1426_v1 }
  0xbd   :  { %961 = vmatpush.bf16.msra.mxu2 %v1399_v20  ;;  %987 = vmatpush.bf16.msrb.mxu0 %v1307_v21 }
  0xc0   :  { %975 = vmatpush.bf16.msra.mxu3 %v1199_v16  ;;  %v499_v16 = vld [vmem:[%s2271_s6] sm:$0x7] }
  0xc1   :  { %962 = vmatpush.bf16.msra.mxu2 %v1387_v29  ;;  %988 = vmatpush.bf16.msrb.mxu0 %v1295_v30  ;;  %v501_v18 = vperm.slane %v499_v16, 0  ;;  %v502_v29 = vperm.slane %v499_v16, 1 }
  0xc4   :  { %976 = vmatpush.bf16.msra.mxu3 %v1187_v25 }
  0xc5   :  { %963 = vmatpush.bf16.msra.mxu2 %v1375_v34  ;;  %989 = vmatpush.bf16.msrb.mxu0 %v1283_v36  ;;  %v503_v36 = vperm.slane %v499_v16, 2 }
 0x125   :  { %v393_v39 = vpop.f32.mrf.mxu0 }
 0x126   :  { %v394_v40 = vadd.f32 %v393_v39, %v226_v38 }
 0x128   :  { %v399_v43 = vmax.f32 %v394_v40, 0.0 }
 0x12a   :  { %v402_v44 = vpack.c.bf16 %v399_v43, %v399_v43  ;;  %v367_v45 = vpop.f32.mrf.mxu2  ;;  %v380_v46 = vpop.f32.mrf.mxu3 }
 0x12b   :  { %v368_v47 = vadd.f32 %v367_v45, %v224_v41  ;;  %v381_v48 = vadd.f32 %v380_v46, %v225_v42 }
 0x12c   :  { %925 = vmatmul.bf16.vlgmr.msrb.gmra.mxu3 %v402_v44 }
 0x12d   :  { %v397_v51 = vmax.f32 %v368_v47, 0.0  ;;  %v398_v52 = vmax.f32 %v381_v48, 0.0  ;;  %v395_v53 = vpop.f32.mrf.mxu0 }
 0x12f   :  { %v400_v55 = vpack.c.bf16 %v397_v51, %v397_v51  ;;  %v401_v56 = vpack.c.bf16 %v398_v52, %v398_v52 }
 0x131   :  { %899 = vmatmul.bf16.vlgmr.msrb.gmra.mxu1 %v400_v55  ;;  %912 = vmatmul.bf16.vlgmr.msrb.gmra.mxu2 %v401_v56 }
 0x132   :  { %938 = vmatmul.bf16.vlgmr.msra.gmra.mxu0 %v400_v55  ;;  %v369_v59 = vpop.f32.mrf.mxu2  ;;  %v382_v60 = vpop.f32.mrf.mxu3  ;;  %995 = vmatpush.bf16.msrb.mxu1 %v1463_v54 }
 0x136   :  { %996 = vmatpush.bf16.msrb.mxu1 %v1451_v61 }
 0x13a   :  { %997 = vmatpush.bf16.msrb.mxu1 %v1439_v0 }
 0x13c   :  { %977 = vmatmul.bf16.vlgmr.msra.gmra.mxu3 %v400_v55 }
 0x13e   :  { %998 = vmatpush.bf16.msrb.mxu1 %v1427_v3 }
 0x141   :  { %951 = vmatmul.bf16.vlgmr.msra.gmra.mxu1 %v401_v56  ;;  %964 = vmatmul.bf16.vlgmr.msra.gmra.mxu2 %v402_v44 }
 0x142   :  { %990 = vmatmul.bf16.vlgmr.msrb.gmra.mxu0 %v401_v56  ;;  %999 = vmatpush.bf16.msrb.mxu1 %v1415_v6 }
 0x146   :  { %1000 = vmatpush.bf16.msrb.mxu1 %v1403_v9 }
 0x14a   :  { %1001 = vmatpush.bf16.msrb.mxu1 %v1391_v12 }
 0x14e   :  { %1002 = vmatpush.bf16.msrb.mxu1 %v1379_v15 }
 0x151   :  { %1003 = vmatmul.bf16.vlgmr.msrb.gmra.mxu1 %v402_v44 }
 0x1ae   :  { %v900_v17 = vpop.f32.mrf.mxu1 }
 0x1af   :  { %v926_v19 = vpop.f32.mrf.mxu3  ;;  %v939_v20 = vpop.f32.mrf.mxu0  ;;  %v901_v21 = vadd.f32 %v900_v17, %v501_v18 }
 0x1b0   :  { %v940_v33 = vadd.f32 %v939_v20, %v502_v29 }
 0x1b4   :  { %v913_v22 = vpop.f32.mrf.mxu2 }
 0x1b5   :  { %v914_v23 = vadd.f32 %v913_v22, %v901_v21 }
 0x1b6   :  { %v902_v24 = vpop.f32.mrf.mxu1 }
 0x1b7   :  { %v927_v25 = vadd.f32 %v926_v19, %v914_v23  ;;  %v928_v26 = vpop.f32.mrf.mxu3  ;;  %v941_v27 = vpop.f32.mrf.mxu0 }
 0x1b9   :  { %1008 = vst [vmem:[%s2272_s7] sm:$0xff] %v927_v25 }
 0x1bc   :  { %v915_v28 = vpop.f32.mrf.mxu2 }
 0x1be   :  { %v952_v30 = vpop.f32.mrf.mxu1 }
 0x1bf   :  { %v978_v31 = vpop.f32.mrf.mxu3  ;;  %v991_v32 = vpop.f32.mrf.mxu0  ;;  %v953_v34 = vadd.f32 %v952_v30, %v940_v33 }
 0x1c0   :  { %v979_v41 = vadd.f32 %v978_v31, %v503_v36 }
 0x1c2   :  { %v992_v43 = vadd.f32 %v991_v32, %v979_v41 }
 0x1c4   :  { %v965_v35 = vpop.f32.mrf.mxu2 }
 0x1c5   :  { %v966_v37 = vadd.f32 %v965_v35, %v953_v34 }
 0x1c6   :  { %v954_v38 = vpop.f32.mrf.mxu1 }
 0x1c7   :  { %1009 = vst [vmem:[%s2272_s7 + $0x8] sm:$0xff] %v966_v37  ;;  %v980_v39 = vpop.f32.mrf.mxu3  ;;  %v993_v40 = vpop.f32.mrf.mxu0 }
 0x1cc   :  { %v967_v42 = vpop.f32.mrf.mxu2 }
 0x1ce   :  { %v1004_v44 = vpop.f32.mrf.mxu1 }
 0x1cf   :  { %v1005_v45 = vadd.f32 %v1004_v44, %v992_v43 }
 0x1d1   :  { %1011 = vst.msk [vmem:[%s2272_s7 + $0x10] sm:$0xff] %vm1010_vm0, %v1005_v45 }
 0x1d6   :  { %v1006_v46 = vpop.f32.mrf.mxu1 }

</bundles_post_ra>
